<compile_context>
chip_gen: v7x
topology: tpu7x:2x2x1
jax: 0.10.0
libtpu: 0.0.40
codegen_flags: <defaults>
</compile_context>

<pallas_src>
import functools
import math

import jax
import jax.numpy as jnp
from jax.experimental import pallas as pl
from jax.experimental.pallas import tpu as pltpu


def _categorical_policy_kernel(x_ref, w_ref, b_ref, logits_ref, logp_ref, *, inv_temperature):
    # Hot path: MXU matmul + bias add + temperature scale + log-softmax (all f32 math).
    x = x_ref[...]
    w = w_ref[...]
    logits = jnp.dot(x, w, preferred_element_type=jnp.float32)
    logits = (logits + b_ref[...].astype(jnp.float32)) * inv_temperature
    logits_ref[...] = logits.astype(logits_ref.dtype)

    # CategoricalDist canonical (normalized) logits = log_softmax(logits).
    m = jnp.max(logits, axis=-1, keepdims=True)
    lse = m + jnp.log(jnp.sum(jnp.exp(logits - m), axis=-1, keepdims=True))
    logp_ref[...] = (logits - lse).astype(logp_ref.dtype)


def _choose_block_b(B, F, A, itemsize, vmem_budget_bytes=12 * 1024 * 1024):
    """Largest batch tile whose double-buffered working set fits a conservative
    VMEM budget (covers v5e's 16 MiB scoped default; v6e/v7x have more)."""
    f_pad = max(128, ((F + 127) // 128) * 128)   # lane-padded x row
    a_pad = max(128, ((A + 127) // 128) * 128)   # lane-padded output row
    # Per batch-row bytes: x (2 buffers) + two f32 outputs (2 buffers each).
    per_row = 2 * f_pad * itemsize + 2 * 2 * a_pad * 4
    tb = vmem_budget_bytes // per_row
    tb = max(8, min(tb, 2048))
    return (tb // 8) * 8  # sublane multiple


def categorical_policy_forward(x, weight_t, bias, temperature=1.0, block_b=None):
    """x: (B, F); weight_t: (F, A) (PyTorch weight.T); bias: (A,).
    Returns (logits, log_probs), both (B, A) float32.

    NOTE: inv_temperature is baked in at trace time; changing temperature
    recompiles, and temperature must be non-zero.
    """
    B, F = x.shape
    F2, A = weight_t.shape
    assert F == F2
    bias2d = bias.reshape(1, A)

    if block_b is None:
        block_b = _choose_block_b(B, F, A, x.dtype.itemsize)
    TB = min(block_b, B)

    # Pad the batch so every grid step sees a full tile; slice outputs back.
    num_tiles = math.ceil(B / TB)
    B_pad = num_tiles * TB
    x_in = x if B_pad == B else jnp.pad(x, ((0, B_pad - B), (0, 0)))

    kernel = functools.partial(
        _categorical_policy_kernel, inv_temperature=float(1.0 / temperature)
    )

    cost = pl.CostEstimate(
        flops=2 * B_pad * F * A,
        transcendentals=B_pad * A,
        bytes_accessed=(
            x_in.dtype.itemsize * B_pad * F
            + weight_t.dtype.itemsize * F * A
            + bias2d.dtype.itemsize * A
            + 2 * 4 * B_pad * A
        ),
    )

    logits, log_probs = pl.pallas_call(
        kernel,
        out_shape=(
            jax.ShapeDtypeStruct((B_pad, A), jnp.float32),
            jax.ShapeDtypeStruct((B_pad, A), jnp.float32),
        ),
        grid=(num_tiles,),
        in_specs=[
            pl.BlockSpec((TB, F), lambda i: (i, 0)),   # streamed batch tiles
            pl.BlockSpec((F, A), lambda i: (0, 0)),    # resident weight
            pl.BlockSpec((1, A), lambda i: (0, 0)),    # resident bias
        ],
        out_specs=(
            pl.BlockSpec((TB, A), lambda i: (i, 0)),
            pl.BlockSpec((TB, A), lambda i: (i, 0)),
        ),
        compiler_params=pltpu.CompilerParams(
            dimension_semantics=("parallel",),  # shard batch tiles across TCs (v7x megacore)
        ),
        cost_estimate=cost,
    )(x_in, weight_t, bias2d)

    if B_pad != B:
        logits = logits[:B]
        log_probs = log_probs[:B]
    return logits, log_probs


def _reference(x, weight, bias, temperature):
    logits = (x @ weight.T + bias) / temperature
    return logits, jax.nn.log_softmax(logits, axis=-1)


if __name__ == "__main__":
    key = jax.random.PRNGKey(0)

    # --- Test 1: small shapes consistent with the module (batch=8, F=32, A=8). ---
    B, F, A = 8, 32, 8
    temperature = 2.0
    kx, kw, kb = jax.random.split(key, 3)
    bound = 1.0 / jnp.sqrt(jnp.float32(F))
    weight = jax.random.uniform(kw, (A, F), jnp.float32, -bound, bound)  # PyTorch layout (A, F)
    bias = jax.random.uniform(kb, (A,), jnp.float32, -bound, bound)
    x = jax.random.normal(kx, (B, F), jnp.float32)

    logits, log_probs = categorical_policy_forward(x, weight.T, bias, temperature)
    logits = jax.block_until_ready(logits)
    log_probs = jax.block_until_ready(log_probs)
    ref_logits, ref_logp = _reference(x, weight, bias, temperature)
    assert jnp.allclose(logits, ref_logits, atol=1e-5, rtol=1e-5)
    assert jnp.allclose(log_probs, ref_logp, atol=1e-5, rtol=1e-5)

    # --- Test 2: exercise the multi-tile grid + padded tail path (B=40, TB=16). ---
    B2 = 40
    kx2 = jax.random.fold_in(key, 1)
    x2 = jax.random.normal(kx2, (B2, F), jnp.float32)
    logits2, log_probs2 = categorical_policy_forward(
        x2, weight.T, bias, temperature=0.7, block_b=16
    )
    logits2 = jax.block_until_ready(logits2)
    log_probs2 = jax.block_until_ready(log_probs2)
    ref_logits2, ref_logp2 = _reference(x2, weight, bias, 0.7)
    assert logits2.shape == (B2, A) and log_probs2.shape == (B2, A)
    assert jnp.allclose(logits2, ref_logits2, atol=1e-5, rtol=1e-5)
    assert jnp.allclose(log_probs2, ref_logp2, atol=1e-5, rtol=1e-5)

    print("KERNEL_OK")
</pallas_src>

<mosaic_0001>
module attributes {stable_mosaic.version = 11 : i64} {
  func.func @_categorical_policy_kernel(%arg0: i32, %arg1: memref<8x32xf32, #tpu.memory_space<vmem>>, %arg2: memref<32x8xf32, #tpu.memory_space<vmem>>, %arg3: memref<1x8xf32, #tpu.memory_space<vmem>>, %arg4: memref<8x8xf32, #tpu.memory_space<vmem>>, %arg5: memref<8x8xf32, #tpu.memory_space<vmem>>) attributes {dimension_semantics = [#tpu.dimension_semantics<parallel>], iteration_bounds = array<i64: 1>, scalar_prefetch = 0 : i64, scratch_operands = 0 : i64, tpu.core_type = #tpu.core_type<tc>, window_params = [{transform_indices = @transform_0, window_bounds = array<i64: 8, 32>}, {pipeline_mode = #tpu.pipeline_mode<synchronous>, transform_indices = @transform_1, window_bounds = array<i64: 32, 8>}, {pipeline_mode = #tpu.pipeline_mode<synchronous>, transform_indices = @transform_2, window_bounds = array<i64: 1, 8>}, {transform_indices = @transform_3, window_bounds = array<i64: 8, 8>}, {transform_indices = @transform_4, window_bounds = array<i64: 8, 8>}]} {
    %c0 = arith.constant 0 : index
    %c0_0 = arith.constant 0 : index
    %0 = vector.load %arg1[%c0, %c0_0] : memref<8x32xf32, #tpu.memory_space<vmem>>, vector<8x32xf32>
    %c0_1 = arith.constant 0 : index
    %c0_2 = arith.constant 0 : index
    %1 = vector.load %arg2[%c0_1, %c0_2] : memref<32x8xf32, #tpu.memory_space<vmem>>, vector<32x8xf32>
    %cst = arith.constant dense<0.000000e+00> : vector<8x8xf32>
    %2 = tpu.matmul %0, %1, %cst {dimension_numbers = #tpu.dot_dimension_numbers<[1], [0], [0], [1], [0, 0, 1, 1], [], []>} : vector<8x32xf32>, vector<32x8xf32>, vector<8x8xf32> -> vector<8x8xf32>
    %c0_3 = arith.constant 0 : index
    %c0_4 = arith.constant 0 : index
    %3 = vector.load %arg3[%c0_3, %c0_4] : memref<1x8xf32, #tpu.memory_space<vmem>>, vector<1x8xf32>
    %4 = vector.broadcast %3 : vector<1x8xf32> to vector<8x8xf32>
    %5 = arith.addf %2, %4 : vector<8x8xf32>
    %cst_5 = arith.constant 5.000000e-01 : f32
    %6 = vector.broadcast %cst_5 : f32 to vector<8x8xf32>
    %7 = arith.mulf %5, %6 : vector<8x8xf32>
    %c0_6 = arith.constant 0 : index
    %c0_7 = arith.constant 0 : index
    %8 = vector.load %arg4[%c0_6, %c0_7] : memref<8x8xf32, #tpu.memory_space<vmem>>, vector<8x8xf32>
    tpu.vector_store %arg4[%c0_6, %c0_7], %7 {strides = array<i32>} : memref<8x8xf32, #tpu.memory_space<vmem>>, vector<8x8xf32>,
    %cst_8 = arith.constant dense<0xFF800000> : vector<8xf32>
    %9 = vector.multi_reduction <maximumf>, %7, %cst_8 [1] : vector<8x8xf32> to vector<8xf32>
    %10 = vector.shape_cast %9 : vector<8xf32> to vector<8x1xf32>
    %11 = vector.broadcast %10 : vector<8x1xf32> to vector<8x8xf32>
    %12 = arith.subf %7, %11 : vector<8x8xf32>
    %13 = math.exp %12 : vector<8x8xf32>
    %cst_9 = arith.constant dense<0.000000e+00> : vector<8xf32>
    %14 = vector.multi_reduction <add>, %13, %cst_9 [1] : vector<8x8xf32> to vector<8xf32>
    %15 = vector.shape_cast %14 : vector<8xf32> to vector<8x1xf32>
    %16 = math.log %15 : vector<8x1xf32>
    %17 = arith.addf %10, %16 : vector<8x1xf32>
    %18 = vector.broadcast %17 : vector<8x1xf32> to vector<8x8xf32>
    %19 = arith.subf %7, %18 : vector<8x8xf32>
    %c0_10 = arith.constant 0 : index
    %c0_11 = arith.constant 0 : index
    %20 = vector.load %arg5[%c0_10, %c0_11] : memref<8x8xf32, #tpu.memory_space<vmem>>, vector<8x8xf32>
    tpu.vector_store %arg5[%c0_10, %c0_11], %19 {strides = array<i32>} : memref<8x8xf32, #tpu.memory_space<vmem>>, vector<8x8xf32>,
    return
  }
  func.func @transform_0(%arg0: i32) -> (i32, i32) {
    %c0_i32 = arith.constant 0 : i32
    %c0_i32_0 = arith.constant 0 : i32
    return %arg0, %c0_i32 : i32, i32
  }
  func.func @transform_1(%arg0: i32) -> (i32, i32) {
    %c0_i32 = arith.constant 0 : i32
    %c0_i32_0 = arith.constant 0 : i32
    %c0_i32_1 = arith.constant 0 : i32
    return %c0_i32, %c0_i32_0 : i32, i32
  }
  func.func @transform_2(%arg0: i32) -> (i32, i32) {
    %c0_i32 = arith.constant 0 : i32
    %c0_i32_0 = arith.constant 0 : i32
    %c0_i32_1 = arith.constant 0 : i32
    return %c0_i32, %c0_i32_0 : i32, i32
  }
  func.func @transform_3(%arg0: i32) -> (i32, i32) {
    %c0_i32 = arith.constant 0 : i32
    %c0_i32_0 = arith.constant 0 : i32
    return %arg0, %c0_i32 : i32, i32
  }
  func.func @transform_4(%arg0: i32) -> (i32, i32) {
    %c0_i32 = arith.constant 0 : i32
    %c0_i32_0 = arith.constant 0 : i32
    return %arg0, %c0_i32 : i32, i32
  }
}

</mosaic_0001>

<bundles_post_ra>
// kernel: tpu_custom_call.1
= control target key start
LH: loop header
LB: loop body
LE: loop exit
PB: predicated region body
PF: predicated region fallthrough
CT: control target
= control target key end

     0   :  { %10 = vsyncpa [#allocation3], 0  ;;  %v230_v3 = vmov 0.0|0.0   ;;  %vm231_vm0 = vmmov 0   ;;  %v232_v6 = vmov 0.0   ;;  %s306_s0 = inlined_call_operand.vmem [shape: f32[8,32], index: 0, kind: input, shape index: {}]   ;;  %s307_s1 = inlined_call_operand.vmem [shape: f32[32,8], index: 1, kind: input, shape index: {}]   ;;  %s308_s2 = inlined_call_operand.vmem [shape: f32[1,8], index: 2, kind: input, shape index: {}]   ;;  %s309_s3 = inlined_call_operand.hbm [shape: f32[8,8], index: 3, kind: output, shape index: {0}]   ;;  %s310_s4 = inlined_call_operand.hbm [shape: f32[8,8], index: 4, kind: output, shape index: {1}]  }
   0x1   :  { %v19_v0 = vld [vmem:[%s307_s1] sm:$0xff]  ;;  %v20_v1 = vld [vmem:[%s307_s1 + $0x8] sm:$0xff]  ;;  %v21_v2 = vld [vmem:[%s307_s1 + $0x10] sm:$0xff]  ;;  %167 = vmatprep.subr.bf16.mxu0 %v230_v3  ;;  %164 = vmatprep.mubr.msk.f32.mxu0 %vm231_vm0, %v232_v6 }
   0x2   :  { %v168_v4 = vpack.c.bf16 %v20_v1, %v19_v0  ;;  %v22_v5 = vld [vmem:[%s307_s1 + $0x18] sm:$0xff] }
   0x3   :  { %11 = vsyncpa [#allocation5], 0  ;;  %v171_v7 = vpack.c.bf16 %v22_v5, %v21_v2  ;;  %v18_v8 = vld [vmem:[%s306_s0] sm:$0xff]  ;;  %vm30_vm1 = vcmask 261120   ;;  %vm105_vm2 = vcmask 64512   ;;  %s233_s0 = smov [#allocation2]  }
   0x4   :  { %169 = vmatpush3.bf16.msra.mxu0 %v168_v4  ;;  %v149_v9 = vld [vmem:[%s308_s2] ss:$0 sm:$0xff]  ;;  %s127_s1 = sshll.u32 %s233_s0, 4  ;;  %s128_s1 = int_to_ptr.vmem [resolvable:$true] %s127_s1 }
   0x5   :  { %170 = vmatprep.subr.bf16.mxu0 %v230_v3  ;;  %s182_s2 = scalar_lea.vmem %s128_s1, 128  ;;  %p187_p1 = scmp.lt.s32.totalorder %s128_s1, %s128_s1 }
   0x6   :  { %p183_p0 = scmp.ne.s32.totalorder %s128_s1, %s182_s2  ;;  %p188_p2 = scmp.lt.s32.totalorder %s182_s2, %s182_s2 }
   0x8   :  { %172 = vmatpush3.bf16.msra.mxu0 %v171_v7  ;;  %p189_p3 = por %p188_p2, %p187_p1 }
   0xa   :  { %p190_p4 = pnand %p189_p3, %p183_p0 }
   0xb   :  { %165 = vmatmul.mubr.msk.f32.vlgmr.msra.gmra.mrb[0].mxu0 %vm30_vm1, %v18_v8 }
  0xde   :  { %v100_v10 = vpop.f32.mrb[0].mxu0 }
  0xdf   :  { %v101_v11 = vadd.f32 %v149_v9, %v100_v10  ;;  %v166_v12 = vpop.f32.mrb[1].mxu0 }
  0xe1   :  { %v104_v13 = vmul.f32 0.5, %v101_v11 }
  0xe3   :  { %v107_v14 = vsel %vm105_vm2, %v104_v13, -inf  ;;  %106 = vst.msk [vmem:[#allocation2] sm:$0xff] %vm105_vm2, %v104_v13 }
  0xe4   :  { %108 = vmax.xlane.f32.xlu0 %v107_v14 }
 0x171   :  { %v109_v15 = vpop.xlane.xlu0 %108 }
 0x172   :  { %v110_v16 = vsub.f32 %v104_v13, %v109_v15 }
 0x174   :  { %v111_v17 = vmul.f32 1.442695, %v110_v16 }
 0x176   :  { %178 = vpow2.f32 %v111_v17 }
 0x180   :  { %v179_v18 = vpop.eup %178 }
 0x181   :  { %v113_v19 = vsel %vm105_vm2, %v179_v18, 0.0 }
 0x182   :  { %114 = vadd.xlane.f32.xlu0 %v113_v19 }
 0x183   :  { %193 = shalt.err (!%p190_p4)
}
 0x184   :  { %s194_s29 = scalar_lea.hbm %s309_s3, 128 }
 0x185   :  { %p195_p5 = scmp.ne.s32.totalorder %s309_s3, %s194_s29  ;;  %p198_p6 = scmp.lt.u32.totalorder %s194_s29, %s309_s3 }
 0x187   :  { %p200_p7 = pnand %p198_p6, %p195_p5 }
 0x189   :  { %203 = shalt.err (!%p200_p7)
}
 0x18a   :  { %130 = dma.vmem_to_hbm [thread:$0]  %s128_s1, 128, %s309_s3, [#allocation3]  }
 0x18b   :  { %s234_s10 = smov [#allocation4]  }
 0x18c   :  { %s137_s11 = sshll.u32 %s234_s10, 4  ;;  %s138_s11 = int_to_ptr.vmem [resolvable:$true] %s137_s11 }
 0x18d   :  { %s204_s12 = scalar_lea.vmem %s138_s11, 128  ;;  %p209_p9 = scmp.lt.s32.totalorder %s138_s11, %s138_s11 }
 0x18e   :  { %p205_p8 = scmp.ne.s32.totalorder %s138_s11, %s204_s12  ;;  %p210_p10 = scmp.lt.s32.totalorder %s204_s12, %s204_s12 }
 0x190   :  { %p211_p11 = por %p210_p10, %p209_p9 }
 0x192   :  { %p212_p12 = pnand %p211_p11, %p205_p8 }
 0x20f   :  { %v115_v20 = vpop.xlane.xlu0 %114 }
 0x210   :  { %180 = vlog2.f32 %v115_v20 }
 0x21a   :  { %v181_v21 = vpop.eup %180 }
 0x21b   :  { %v117_v22 = vmul.f32 0.6931472, %v181_v21 }
 0x21d   :  { %v118_v23 = vadd.f32 %v117_v22, %v109_v15 }
 0x21f   :  { %v119_v24 = vsub.f32 %v104_v13, %v118_v23 }
 0x221   :  { %120 = vst.msk [vmem:[#allocation4] sm:$0xff] %vm105_vm2, %v119_v24 }
 0x222   :  { %215 = shalt.err (!%p212_p12)
}
 0x223   :  { %s216_s14 = scalar_lea.hbm %s310_s4, 128 }
 0x224   :  { %p217_p13 = scmp.ne.s32.totalorder %s310_s4, %s216_s14  ;;  %p220_p0 = scmp.lt.u32.totalorder %s216_s14, %s310_s4 }
 0x226   :  { %p222_p1 = pnand %p220_p0, %p217_p13 }
 0x228   :  { %225 = shalt.err (!%p222_p1)
}
 0x229   :  { %140 = dma.vmem_to_hbm [thread:$0]  %s138_s11, 128, %s310_s4, [#allocation5]  }
 0x22a   :  { %226 = dma.done.wait [#allocation3], 128  }
 0x22b   :  { %227 = vsyncadd [#allocation3], 4294967168 }
 0x22c   :  { %228 = dma.done.wait [#allocation5], 128  }
 0x22d   :  { %229 = vsyncadd [#allocation5], 4294967168 }
 0x22e   :  { %147 = vsyncpa [#allocation3], 1 }
 0x22f   :  { %148 = vsyncpa [#allocation5], 1 }

</bundles_post_ra>
